<compile_context>
chip_gen: v5e
topology: v5e:2x2
jax: 0.10.0
libtpu: 0.0.40
codegen_flags: <defaults>
</compile_context>

<pallas_src>
import math

import jax
import jax.numpy as jnp
from jax import lax
from jax.experimental import pallas as pl
from jax.experimental.pallas import tpu as pltpu  # noqa: F401

DROPOUT_P = 0.1


def _attn_kernel(q_ref, kv_ref, u_ref, o_ref):
    """Single-invocation attention over all batches.

    q_ref:  (B, Lq, D)  f32  queries        (embed(x2))
    kv_ref: (B, Lk, D)  f32  keys == values (embed(x1)), gathered once
    u_ref:  (B, Lq, Lk) f32  uniform[0,1) randoms for dropout
    o_ref:  (Lq, B*D)   f32  lane-dense output slab (batch folded into lanes)
    """
    B, Lq, D = q_ref.shape
    inv_scale = 1.0 / math.sqrt(float(D))
    keep_scale = 1.0 / (1.0 - DROPOUT_P)

    outs = []
    for b in range(B):  # B = 4, fully unrolled; everything is tiny
        q = q_ref[b]    # (Lq, D)
        kv = kv_ref[b]  # (Lk, D)

        # q @ k^T without materializing a transpose: contract the D axes.
        s = lax.dot_general(
            q, kv, (((1,), (1,)), ((), ())),
            preferred_element_type=jnp.float32) * inv_scale       # (Lq, Lk)

        # numerically-stable softmax over the key axis
        m = jnp.max(s, axis=-1, keepdims=True)
        e = jnp.exp(s - m)
        p = e * pl.reciprocal(jnp.sum(e, axis=-1, keepdims=True), approx=True)

        # dropout(p=0.1), training-mode semantics (F.dropout default)
        keep = u_ref[b] >= DROPOUT_P
        p = jnp.where(keep, p * keep_scale, 0.0)

        # attn @ v   (v == kv)
        outs.append(jnp.dot(p, kv, preferred_element_type=jnp.float32))  # (Lq, D)

    # One full-width 128-lane store instead of B masked 32-lane stores.
    o_ref[...] = jnp.concatenate(outs, axis=-1)                   # (Lq, B*D)


def attention_pallas(q, kv, u):
    """q: (B, Lq, D), kv: (B, Lk, D), u: (B, Lq, Lk) -> (B, Lq, D), all f32."""
    B, Lq, D = q.shape
    _, Lk, _ = kv.shape
    out_slab = pl.pallas_call(
        _attn_kernel,
        out_shape=jax.ShapeDtypeStruct((Lq, B * D), jnp.float32),
        in_specs=[
            pl.BlockSpec((B, Lq, D), lambda: (0, 0, 0)),
            pl.BlockSpec((B, Lk, D), lambda: (0, 0, 0)),
            pl.BlockSpec((B, Lq, Lk), lambda: (0, 0, 0)),
        ],
        out_specs=pl.BlockSpec((Lq, B * D), lambda: (0, 0)),
    )(q, kv, u)
    # (Lq, B*D) -> (B, Lq, D): layout plumbing outside the kernel.
    return jnp.transpose(out_slab.reshape(Lq, B, D), (1, 0, 2))


def model_forward(embed_table, x1, x2, dropout_key):
    # Embedding lookups (plain-JAX glue). k and v are identical -> gather once.
    kv = jnp.take(embed_table, x1, axis=0)   # (B, Lk, D)
    q = jnp.take(embed_table, x2, axis=0)    # (B, Lq, D)
    B, Lq, _ = q.shape
    Lk = kv.shape[1]
    # Dropout randoms generated host-side (portable across TPU and interpret;
    # no TPU-only PRNG primitives in the kernel).
    u = jax.random.uniform(dropout_key, (B, Lq, Lk), dtype=jnp.float32)
    return attention_pallas(q, kv, u)


if __name__ == "__main__":
    key = jax.random.PRNGKey(0)
    k_embed, k_x1, k_x2, k_drop = jax.random.split(key, 4)

    # nn.Embedding(32, 32) weight, deterministic standard-normal init
    embed_table = jax.random.normal(k_embed, (32, 32), dtype=jnp.float32)

    # x1: (4, 8) long in [0, 3); x2: (4, 4) long in [0, 3)
    x1 = jax.random.randint(k_x1, (4, 8), 0, 3, dtype=jnp.int32)
    x2 = jax.random.randint(k_x2, (4, 4), 0, 3, dtype=jnp.int32)

    out = model_forward(embed_table, x1, x2, k_drop)
    out = jax.block_until_ready(out)

    assert out.shape == (4, 4, 32)
    assert out.dtype == jnp.float32
    assert bool(jnp.all(jnp.isfinite(out)))
    print("KERNEL_OK")
</pallas_src>

<mosaic_0001>
module attributes {stable_mosaic.version = 11 : i64} {
  func.func @_attn_kernel(%arg0: memref<4x4x32xf32, #tpu.memory_space<vmem>>, %arg1: memref<4x8x32xf32, #tpu.memory_space<vmem>>, %arg2: memref<4x4x8xf32, #tpu.memory_space<vmem>>, %arg3: memref<4x128xf32, #tpu.memory_space<vmem>>) attributes {dimension_semantics = [], scalar_prefetch = 0 : i64, scratch_operands = 0 : i64, tpu.core_type = #tpu.core_type<tc>} {
    %c0 = arith.constant 0 : index
    %c0_0 = arith.constant 0 : index
    %c0_1 = arith.constant 0 : index
    %0 = vector.load %arg0[%c0, %c0_0, %c0_1] : memref<4x4x32xf32, #tpu.memory_space<vmem>>, vector<1x4x32xf32>
    %1 = vector.shape_cast %0 : vector<1x4x32xf32> to vector<4x32xf32>
    %c0_2 = arith.constant 0 : index
    %c0_3 = arith.constant 0 : index
    %c0_4 = arith.constant 0 : index
    %2 = vector.load %arg1[%c0_2, %c0_3, %c0_4] : memref<4x8x32xf32, #tpu.memory_space<vmem>>, vector<1x8x32xf32>
    %3 = vector.shape_cast %2 : vector<1x8x32xf32> to vector<8x32xf32>
    %cst = arith.constant dense<0.000000e+00> : vector<4x8xf32>
    %4 = tpu.matmul %1, %3, %cst {dimension_numbers = #tpu.dot_dimension_numbers<[1], [1], [0], [0], [0, 0, 1, 0], [], []>} : vector<4x32xf32>, vector<8x32xf32>, vector<4x8xf32> -> vector<4x8xf32>
    %cst_5 = arith.constant 0.176776692 : f32
    %5 = vector.broadcast %cst_5 : f32 to vector<4x8xf32>
    %6 = arith.mulf %4, %5 : vector<4x8xf32>
    %cst_6 = arith.constant dense<0xFF800000> : vector<4xf32>
    %7 = vector.multi_reduction <maximumf>, %6, %cst_6 [1] : vector<4x8xf32> to vector<4xf32>
    %8 = vector.shape_cast %7 : vector<4xf32> to vector<4x1xf32>
    %9 = vector.broadcast %8 : vector<4x1xf32> to vector<4x8xf32>
    %10 = arith.subf %6, %9 : vector<4x8xf32>
    %11 = math.exp %10 : vector<4x8xf32>
    %cst_7 = arith.constant dense<0.000000e+00> : vector<4xf32>
    %12 = vector.multi_reduction <add>, %11, %cst_7 [1] : vector<4x8xf32> to vector<4xf32>
    %13 = vector.shape_cast %12 : vector<4xf32> to vector<4x1xf32>
    %14 = tpu.reciprocal %13 {approx = true} : vector<4x1xf32> -> vector<4x1xf32>
    %15 = vector.broadcast %14 : vector<4x1xf32> to vector<4x8xf32>
    %16 = arith.mulf %11, %15 : vector<4x8xf32>
    %c0_8 = arith.constant 0 : index
    %c0_9 = arith.constant 0 : index
    %c0_10 = arith.constant 0 : index
    %17 = vector.load %arg2[%c0_8, %c0_9, %c0_10] : memref<4x4x8xf32, #tpu.memory_space<vmem>>, vector<1x4x8xf32>
    %18 = vector.shape_cast %17 : vector<1x4x8xf32> to vector<4x8xf32>
    %cst_11 = arith.constant 1.000000e-01 : f32
    %19 = vector.broadcast %cst_11 : f32 to vector<4x8xf32>
    %20 = arith.cmpf oge, %18, %19 : vector<4x8xf32>
    %cst_12 = arith.constant 1.11111116 : f32
    %21 = vector.broadcast %cst_12 : f32 to vector<4x8xf32>
    %22 = arith.mulf %16, %21 : vector<4x8xf32>
    %cst_13 = arith.constant 0.000000e+00 : f32
    %23 = vector.broadcast %cst_13 : f32 to vector<4x8xf32>
    %24 = arith.select %20, %22, %23 : vector<4x8xi1>, vector<4x8xf32>
    %cst_14 = arith.constant dense<0.000000e+00> : vector<4x32xf32>
    %25 = tpu.matmul %24, %3, %cst_14 {dimension_numbers = #tpu.dot_dimension_numbers<[1], [0], [0], [1], [0, 0, 1, 1], [], []>} : vector<4x8xf32>, vector<8x32xf32>, vector<4x32xf32> -> vector<4x32xf32>
    %c1 = arith.constant 1 : index
    %c0_15 = arith.constant 0 : index
    %c0_16 = arith.constant 0 : index
    %26 = vector.load %arg0[%c1, %c0_15, %c0_16] : memref<4x4x32xf32, #tpu.memory_space<vmem>>, vector<1x4x32xf32>
    %27 = vector.shape_cast %26 : vector<1x4x32xf32> to vector<4x32xf32>
    %c1_17 = arith.constant 1 : index
    %c0_18 = arith.constant 0 : index
    %c0_19 = arith.constant 0 : index
    %28 = vector.load %arg1[%c1_17, %c0_18, %c0_19] : memref<4x8x32xf32, #tpu.memory_space<vmem>>, vector<1x8x32xf32>
    %29 = vector.shape_cast %28 : vector<1x8x32xf32> to vector<8x32xf32>
    %cst_20 = arith.constant dense<0.000000e+00> : vector<4x8xf32>
    %30 = tpu.matmul %27, %29, %cst_20 {dimension_numbers = #tpu.dot_dimension_numbers<[1], [1], [0], [0], [0, 0, 1, 0], [], []>} : vector<4x32xf32>, vector<8x32xf32>, vector<4x8xf32> -> vector<4x8xf32>
    %cst_21 = arith.constant 0.176776692 : f32
    %31 = vector.broadcast %cst_21 : f32 to vector<4x8xf32>
    %32 = arith.mulf %30, %31 : vector<4x8xf32>
    %cst_22 = arith.constant dense<0xFF800000> : vector<4xf32>
    %33 = vector.multi_reduction <maximumf>, %32, %cst_22 [1] : vector<4x8xf32> to vector<4xf32>
    %34 = vector.shape_cast %33 : vector<4xf32> to vector<4x1xf32>
    %35 = vector.broadcast %34 : vector<4x1xf32> to vector<4x8xf32>
    %36 = arith.subf %32, %35 : vector<4x8xf32>
    %37 = math.exp %36 : vector<4x8xf32>
    %cst_23 = arith.constant dense<0.000000e+00> : vector<4xf32>
    %38 = vector.multi_reduction <add>, %37, %cst_23 [1] : vector<4x8xf32> to vector<4xf32>
    %39 = vector.shape_cast %38 : vector<4xf32> to vector<4x1xf32>
    %40 = tpu.reciprocal %39 {approx = true} : vector<4x1xf32> -> vector<4x1xf32>
    %41 = vector.broadcast %40 : vector<4x1xf32> to vector<4x8xf32>
    %42 = arith.mulf %37, %41 : vector<4x8xf32>
    %c1_24 = arith.constant 1 : index
    %c0_25 = arith.constant 0 : index
    %c0_26 = arith.constant 0 : index
    %43 = vector.load %arg2[%c1_24, %c0_25, %c0_26] : memref<4x4x8xf32, #tpu.memory_space<vmem>>, vector<1x4x8xf32>
    %44 = vector.shape_cast %43 : vector<1x4x8xf32> to vector<4x8xf32>
    %cst_27 = arith.constant 1.000000e-01 : f32
    %45 = vector.broadcast %cst_27 : f32 to vector<4x8xf32>
    %46 = arith.cmpf oge, %44, %45 : vector<4x8xf32>
    %cst_28 = arith.constant 1.11111116 : f32
    %47 = vector.broadcast %cst_28 : f32 to vector<4x8xf32>
    %48 = arith.mulf %42, %47 : vector<4x8xf32>
    %cst_29 = arith.constant 0.000000e+00 : f32
    %49 = vector.broadcast %cst_29 : f32 to vector<4x8xf32>
    %50 = arith.select %46, %48, %49 : vector<4x8xi1>, vector<4x8xf32>
    %cst_30 = arith.constant dense<0.000000e+00> : vector<4x32xf32>
    %51 = tpu.matmul %50, %29, %cst_30 {dimension_numbers = #tpu.dot_dimension_numbers<[1], [0], [0], [1], [0, 0, 1, 1], [], []>} : vector<4x8xf32>, vector<8x32xf32>, vector<4x32xf32> -> vector<4x32xf32>
    %c2 = arith.constant 2 : index
    %c0_31 = arith.constant 0 : index
    %c0_32 = arith.constant 0 : index
    %52 = vector.load %arg0[%c2, %c0_31, %c0_32] : memref<4x4x32xf32, #tpu.memory_space<vmem>>, vector<1x4x32xf32>
    %53 = vector.shape_cast %52 : vector<1x4x32xf32> to vector<4x32xf32>
    %c2_33 = arith.constant 2 : index
    %c0_34 = arith.constant 0 : index
    %c0_35 = arith.constant 0 : index
    %54 = vector.load %arg1[%c2_33, %c0_34, %c0_35] : memref<4x8x32xf32, #tpu.memory_space<vmem>>, vector<1x8x32xf32>
    %55 = vector.shape_cast %54 : vector<1x8x32xf32> to vector<8x32xf32>
    %cst_36 = arith.constant dense<0.000000e+00> : vector<4x8xf32>
    %56 = tpu.matmul %53, %55, %cst_36 {dimension_numbers = #tpu.dot_dimension_numbers<[1], [1], [0], [0], [0, 0, 1, 0], [], []>} : vector<4x32xf32>, vector<8x32xf32>, vector<4x8xf32> -> vector<4x8xf32>
    %cst_37 = arith.constant 0.176776692 : f32
    %57 = vector.broadcast %cst_37 : f32 to vector<4x8xf32>
    %58 = arith.mulf %56, %57 : vector<4x8xf32>
    %cst_38 = arith.constant dense<0xFF800000> : vector<4xf32>
    %59 = vector.multi_reduction <maximumf>, %58, %cst_38 [1] : vector<4x8xf32> to vector<4xf32>
    %60 = vector.shape_cast %59 : vector<4xf32> to vector<4x1xf32>
    %61 = vector.broadcast %60 : vector<4x1xf32> to vector<4x8xf32>
    %62 = arith.subf %58, %61 : vector<4x8xf32>
    %63 = math.exp %62 : vector<4x8xf32>
    %cst_39 = arith.constant dense<0.000000e+00> : vector<4xf32>
    %64 = vector.multi_reduction <add>, %63, %cst_39 [1] : vector<4x8xf32> to vector<4xf32>
    %65 = vector.shape_cast %64 : vector<4xf32> to vector<4x1xf32>
    %66 = tpu.reciprocal %65 {approx = true} : vector<4x1xf32> -> vector<4x1xf32>
    %67 = vector.broadcast %66 : vector<4x1xf32> to vector<4x8xf32>
    %68 = arith.mulf %63, %67 : vector<4x8xf32>
    %c2_40 = arith.constant 2 : index
    %c0_41 = arith.constant 0 : index
    %c0_42 = arith.constant 0 : index
    %69 = vector.load %arg2[%c2_40, %c0_41, %c0_42] : memref<4x4x8xf32, #tpu.memory_space<vmem>>, vector<1x4x8xf32>
    %70 = vector.shape_cast %69 : vector<1x4x8xf32> to vector<4x8xf32>
    %cst_43 = arith.constant 1.000000e-01 : f32
    %71 = vector.broadcast %cst_43 : f32 to vector<4x8xf32>
    %72 = arith.cmpf oge, %70, %71 : vector<4x8xf32>
    %cst_44 = arith.constant 1.11111116 : f32
    %73 = vector.broadcast %cst_44 : f32 to vector<4x8xf32>
    %74 = arith.mulf %68, %73 : vector<4x8xf32>
    %cst_45 = arith.constant 0.000000e+00 : f32
    %75 = vector.broadcast %cst_45 : f32 to vector<4x8xf32>
    %76 = arith.select %72, %74, %75 : vector<4x8xi1>, vector<4x8xf32>
    %cst_46 = arith.constant dense<0.000000e+00> : vector<4x32xf32>
    %77 = tpu.matmul %76, %55, %cst_46 {dimension_numbers = #tpu.dot_dimension_numbers<[1], [0], [0], [1], [0, 0, 1, 1], [], []>} : vector<4x8xf32>, vector<8x32xf32>, vector<4x32xf32> -> vector<4x32xf32>
    %c3 = arith.constant 3 : index
    %c0_47 = arith.constant 0 : index
    %c0_48 = arith.constant 0 : index
    %78 = vector.load %arg0[%c3, %c0_47, %c0_48] : memref<4x4x32xf32, #tpu.memory_space<vmem>>, vector<1x4x32xf32>
    %79 = vector.shape_cast %78 : vector<1x4x32xf32> to vector<4x32xf32>
    %c3_49 = arith.constant 3 : index
    %c0_50 = arith.constant 0 : index
    %c0_51 = arith.constant 0 : index
    %80 = vector.load %arg1[%c3_49, %c0_50, %c0_51] : memref<4x8x32xf32, #tpu.memory_space<vmem>>, vector<1x8x32xf32>
    %81 = vector.shape_cast %80 : vector<1x8x32xf32> to vector<8x32xf32>
    %cst_52 = arith.constant dense<0.000000e+00> : vector<4x8xf32>
    %82 = tpu.matmul %79, %81, %cst_52 {dimension_numbers = #tpu.dot_dimension_numbers<[1], [1], [0], [0], [0, 0, 1, 0], [], []>} : vector<4x32xf32>, vector<8x32xf32>, vector<4x8xf32> -> vector<4x8xf32>
    %cst_53 = arith.constant 0.176776692 : f32
    %83 = vector.broadcast %cst_53 : f32 to vector<4x8xf32>
    %84 = arith.mulf %82, %83 : vector<4x8xf32>
    %cst_54 = arith.constant dense<0xFF800000> : vector<4xf32>
    %85 = vector.multi_reduction <maximumf>, %84, %cst_54 [1] : vector<4x8xf32> to vector<4xf32>
    %86 = vector.shape_cast %85 : vector<4xf32> to vector<4x1xf32>
    %87 = vector.broadcast %86 : vector<4x1xf32> to vector<4x8xf32>
    %88 = arith.subf %84, %87 : vector<4x8xf32>
    %89 = math.exp %88 : vector<4x8xf32>
    %cst_55 = arith.constant dense<0.000000e+00> : vector<4xf32>
    %90 = vector.multi_reduction <add>, %89, %cst_55 [1] : vector<4x8xf32> to vector<4xf32>
    %91 = vector.shape_cast %90 : vector<4xf32> to vector<4x1xf32>
    %92 = tpu.reciprocal %91 {approx = true} : vector<4x1xf32> -> vector<4x1xf32>
    %93 = vector.broadcast %92 : vector<4x1xf32> to vector<4x8xf32>
    %94 = arith.mulf %89, %93 : vector<4x8xf32>
    %c3_56 = arith.constant 3 : index
    %c0_57 = arith.constant 0 : index
    %c0_58 = arith.constant 0 : index
    %95 = vector.load %arg2[%c3_56, %c0_57, %c0_58] : memref<4x4x8xf32, #tpu.memory_space<vmem>>, vector<1x4x8xf32>
    %96 = vector.shape_cast %95 : vector<1x4x8xf32> to vector<4x8xf32>
    %cst_59 = arith.constant 1.000000e-01 : f32
    %97 = vector.broadcast %cst_59 : f32 to vector<4x8xf32>
    %98 = arith.cmpf oge, %96, %97 : vector<4x8xf32>
    %cst_60 = arith.constant 1.11111116 : f32
    %99 = vector.broadcast %cst_60 : f32 to vector<4x8xf32>
    %100 = arith.mulf %94, %99 : vector<4x8xf32>
    %cst_61 = arith.constant 0.000000e+00 : f32
    %101 = vector.broadcast %cst_61 : f32 to vector<4x8xf32>
    %102 = arith.select %98, %100, %101 : vector<4x8xi1>, vector<4x8xf32>
    %cst_62 = arith.constant dense<0.000000e+00> : vector<4x32xf32>
    %103 = tpu.matmul %102, %81, %cst_62 {dimension_numbers = #tpu.dot_dimension_numbers<[1], [0], [0], [1], [0, 0, 1, 1], [], []>} : vector<4x8xf32>, vector<8x32xf32>, vector<4x32xf32> -> vector<4x32xf32>
    %104 = tpu.concatenate %25, %51, %77, %103 in 1 : vector<4x32xf32>, vector<4x32xf32>, vector<4x32xf32>, vector<4x32xf32> -> vector<4x128xf32>
    %c0_63 = arith.constant 0 : index
    %c0_64 = arith.constant 0 : index
    %105 = vector.load %arg3[%c0_63, %c0_64] : memref<4x128xf32, #tpu.memory_space<vmem>>, vector<4x128xf32>
    tpu.vector_store %arg3[%c0_63, %c0_64], %104 {strides = array<i32>} : memref<4x128xf32, #tpu.memory_space<vmem>>, vector<4x128xf32>,
    return
  }
}

</mosaic_0001>

<bundles_post_ra>
// kernel: tpu_custom_call.1
= control target key start
LH: loop header
LB: loop body
LE: loop exit
PB: predicated region body
PF: predicated region fallthrough
CT: control target
= control target key end

     0   :  { %8 = vsyncpa [#allocation3], 0  ;;  %s586_s0 = inlined_call_operand.hbm [shape: f32[4,4,32], index: 0, kind: input, shape index: {}]   ;;  %s587_s1 = inlined_call_operand.hbm [shape: f32[4,8,32], index: 1, kind: input, shape index: {}]   ;;  %s588_s2 = inlined_call_operand.hbm [shape: f32[4,4,8], index: 2, kind: input, shape index: {}]   ;;  %s589_s3 = inlined_call_operand.hbm [shape: f32[4,128], index: 3, kind: output, shape index: {}]  }
   0x1   :  { %9 = vsyncpa [#allocation6], 0  ;;  %s28_s14 = sshll.u32 %s587_s1, 4  ;;  %s29_s14 = int_to_ptr.hbm [resolvable:$true] %s28_s14 }
   0x2   :  { %10 = vsyncpa [#allocation4], 0  ;;  %s518_s15 = smov [#allocation5]   ;;  %s15_s19 = sshll.u32 %s586_s0, 4  ;;  %s16_s19 = int_to_ptr.hbm [resolvable:$true] %s15_s19 }
   0x3   :  { %s30_s16 = sshll.u32 %s518_s15, 4  ;;  %s519_s20 = smov 128   ;;  %s31_s16 = int_to_ptr.vmem [resolvable:$true] %s30_s16 }
   0x4   :  { %s520_s21 = smov 8   ;;  %s521_s22 = smov [#allocation2]  }
   0x5   :  { %36 = dma.hbm_to_vmem [thread:$0]  %s29_s14, 512, %s31_s16, [#allocation6], %s519_s20, %s519_s20, %s520_s21  }
   0x6   :  { %s17_s23 = sshll.u32 %s521_s22, 4  ;;  %s522_s24 = smov 64   ;;  %s18_s23 = int_to_ptr.vmem [resolvable:$true] %s17_s23 }
   0x7   :  { %s523_s25 = smov 4   ;;  %s41_s27 = sshll.u32 %s588_s2, 4  ;;  %s42_s27 = int_to_ptr.hbm [resolvable:$true] %s41_s27 }
   0x8   :  { %23 = dma.hbm_to_vmem [thread:$0]  %s16_s19, 256, %s18_s23, [#allocation3], %s522_s24, %s522_s24, %s523_s25  }
   0x9   :  { %s524_s28 = smov [#allocation7]  }
   0xa   :  { %s43_s29 = sshll.u32 %s524_s28, 4  ;;  %s44_s29 = int_to_ptr.vmem [resolvable:$true] %s43_s29 }
   0xb   :  { %49 = dma.hbm_to_vmem [thread:$0]  %s42_s27, 256, %s44_s29, [#allocation6], %s522_s24, %s522_s24, %s523_s25  }
   0xc   :  { %512 = dma.done.wait [#allocation3], 256  }
   0xd   :  { %513 = vsyncadd [#allocation3], 4294967040 }
   0xe   :  { %514 = dma.done.wait [#allocation6], 768  }
   0xf   :  { %515 = vsyncadd [#allocation6], 4294966528  ;;  %vm64_vm0 = vcmask 261120   ;;  %v63_v0 = vld [vmem:[#allocation5] sm:$0xff]  ;;  %v135_v1 = vld [vmem:[#allocation5 + $0x8] sm:$0xff]  ;;  %vm92_vm1 = vcmask 60416  }
  0x10   :  { %378 = vmatpush.xpose.msk.msra.mxu0 %vm64_vm0, %v63_v0  ;;  %381 = vmatpush.xpose.msk.msra.mxu2 %vm64_vm0, %v135_v1  ;;  %v62_v2 = vld [vmem:[#allocation2] sm:$0xf]  ;;  %v133_v3 = vld [vmem:[#allocation2 + $0x4] sm:$0xf]  ;;  %v275_v4 = vld [vmem:[#allocation5 + $0x18] sm:$0xff]  ;;  %vm108_vm3 = vcmask 64512  }
  0x11   :  { %127 = vmatpush.msra.mxu1 %v63_v0  ;;  %197 = vmatpush.msra.mxu3 %v135_v1  ;;  %v273_v5 = vld [vmem:[#allocation2 + $0xc] sm:$0xf]  ;;  %v205_v25 = vld [vmem:[#allocation5 + $0x10] sm:$0xff]  ;;  %v104_v29 = vld [vmem:[#allocation7] sm:$0xf]  ;;  %s525_s0 = smov 32  }
  0x12   :  { %vm105_vm2 = vcmp.ge.f32.partialorder %v104_v29, 0.1  ;;  %v175_v34 = vld [vmem:[#allocation7 + $0x4] sm:$0xf]  ;;  %v203_v39 = vld [vmem:[#allocation2 + $0x8] sm:$0xf] }
  0x13   :  { %379 = vmatmul.msk.f32.vlgmr.msra.gmra.mxu0 %vm64_vm0, %v62_v2  ;;  %382 = vmatmul.msk.f32.vlgmr.msra.gmra.mxu2 %vm64_vm0, %v133_v3  ;;  %vm176_vm4 = vcmp.ge.f32.partialorder %v175_v34, 0.1  ;;  %v315_v55 = vld [vmem:[#allocation7 + $0xc] sm:$0xf]  ;;  %v245_v61 = vld [vmem:[#allocation7 + $0x8] sm:$0xf] }
  0x14   :  { %387 = vmatpush.xpose.msk.msrb.mxu0 %vm64_vm0, %v275_v4  ;;  %337 = vmatpush.msrb.mxu2 %v275_v4  ;;  %vm316_vm5 = vcmp.ge.f32.partialorder %v315_v55, 0.1  ;;  %vm246_vm6 = vcmp.ge.f32.partialorder %v245_v61, 0.1  ;;  %s526_s2 = smov 96   ;;  %vm355_vm7 = vcmask 523264  }
  0x15   :  { %384 = vmatpush.xpose.msk.msrb.mxu1 %vm64_vm0, %v205_v25  ;;  %267 = vmatpush.msrb.mxu3 %v205_v25  ;;  %s527_s30 = smov [#allocation8]   ;;  %s367_s7 = sshll.u32 %s589_s3, 4  ;;  %vm357_vm8 = vcmask 785408   ;;  %s368_s7 = int_to_ptr.hbm [resolvable:$true] %s367_s7 }
  0x16   :  { %s365_s4 = sshll.u32 %s527_s30, 4  ;;  %s366_s4 = int_to_ptr.vmem [resolvable:$true] %s365_s4 }
  0x1b   :  { %388 = vmatmul.msk.f32.vlgmr.msrb.gmra.mxu0 %vm64_vm0, %v273_v5 }
  0x90   :  { %v88_v6 = vpop.f32.mrf.mxu0 }
  0x91   :  { %v91_v7 = vmul.f32 0.17677669, %v88_v6 }
  0x93   :  { %v93_v8 = vsel %vm92_vm1, %v91_v7, -inf }
  0x94   :  { %94 = vmax.xlane.f32.xlu0 %v93_v8 }
  0x96   :  { %v159_v9 = vpop.f32.mrf.mxu2 }
  0x97   :  { %v162_v10 = vmul.f32 0.17677669, %v159_v9 }
  0x98   :  { %v299_v12 = vpop.f32.mrf.mxu0 }
  0x99   :  { %v163_v11 = vsel %vm92_vm1, %v162_v10, -inf  ;;  %v302_v13 = vmul.f32 0.17677669, %v299_v12 }
  0x9a   :  { %164 = vmax.xlane.f32.xlu1 %v163_v11 }
  0x9b   :  { %v303_v14 = vsel %vm92_vm1, %v302_v13, -inf }
  0x9c   :  { %304 = vmax.xlane.f32.xlu2 %v303_v14 }
 0x107   :  { %v95_v15 = vpop.xlane.xlu0 %94 }
 0x108   :  { %v96_v16 = vsub.f32 %v91_v7, %v95_v15 }
 0x10a   :  { %v97_v17 = vmul.f32 1.442695, %v96_v16 }
 0x10c   :  { %400 = vpow2.f32 %v97_v17 }
 0x10d   :  { %v165_v18 = vpop.xlane.xlu1 %164 }
 0x10e   :  { %v166_v19 = vsub.f32 %v162_v10, %v165_v18 }
 0x10f   :  { %v305_v26 = vpop.xlane.xlu2 %304 }
 0x110   :  { %v167_v20 = vmul.f32 1.442695, %v166_v19  ;;  %v306_v40 = vsub.f32 %v302_v13, %v305_v26 }
 0x112   :  { %v401_v21 = vpop.eup %400  ;;  %402 = vpow2.f32 %v167_v20  ;;  %v307_v42 = vmul.f32 1.442695, %v306_v40 }
 0x113   :  { %v99_v22 = vsel %vm92_vm1, %v401_v21, 0.0 }
 0x114   :  { %100 = vadd.xlane.f32.xlu0 %v99_v22 }
 0x118   :  { %v403_v23 = vpop.eup %402 }
 0x119   :  { %v169_v24 = vsel %vm92_vm1, %v403_v23, 0.0 }
 0x11a   :  { %170 = vadd.xlane.f32.xlu2 %v169_v24 }
 0x187   :  { %v101_v27 = vpop.xlane.xlu0 %100 }
 0x188   :  { %404 = vrcp.f32 %v101_v27 }
 0x18d   :  { %v171_v28 = vpop.xlane.xlu2 %170 }
 0x18e   :  { %v405_v30 = vpop.eup %404  ;;  %406 = vrcp.f32 %v171_v28 }
 0x18f   :  { %v103_v31 = vmul.f32 %v405_v30, %v401_v21  ;;  %408 = vpow2.f32 %v307_v42 }
 0x191   :  { %v106_v32 = vmul.f32 1.1111112, %v103_v31 }
 0x193   :  { %v107_v33 = vsel %vm105_vm2, %v106_v32, 0.0 }
 0x194   :  { %v407_v35 = vpop.eup %406  ;;  %380 = vmatmul.msk.f32.vlgmr.msra.gmra.mxu1 %vm108_vm3, %v107_v33 }
 0x195   :  { %v173_v36 = vmul.f32 %v407_v35, %v403_v23  ;;  %v409_v47 = vpop.eup %408 }
 0x196   :  { %v309_v48 = vsel %vm92_vm1, %v409_v47, 0.0 }
 0x197   :  { %v177_v37 = vmul.f32 1.1111112, %v173_v36 }
 0x199   :  { %v178_v38 = vsel %vm176_vm4, %v177_v37, 0.0 }
 0x19a   :  { %383 = vmatmul.msk.f32.vlgmr.msra.gmra.mxu3 %vm108_vm3, %v178_v38 }
 0x19c   :  { %385 = vmatmul.msk.f32.vlgmr.msrb.gmra.mxu1 %vm64_vm0, %v203_v39 }
 0x211   :  { %v129_v41 = vpop.f32.mrf.mxu1 }
 0x219   :  { %v229_v43 = vpop.f32.mrf.mxu1 }
 0x21a   :  { %v232_v44 = vmul.f32 0.17677669, %v229_v43 }
 0x21c   :  { %v233_v45 = vsel %vm92_vm1, %v232_v44, -inf }
 0x21d   :  { %v199_v46 = vpop.f32.mrf.mxu3  ;;  %234 = vmax.xlane.f32.xlu1 %v233_v45 }
 0x21e   :  { %343 = vrot.lane.b32.xlu2 %v199_v46, %s525_s0 }
 0x225   :  { %310 = vadd.xlane.f32.xlu1 %v309_v48 }
 0x278   :  { %v344_v4 = vpop.permute.xlu2 %343 }
 0x279   :  { %v354_v5 = vsel %vm64_vm0, %v129_v41, %v344_v4 }
 0x290   :  { %v235_v49 = vpop.xlane.xlu1 %234 }
 0x291   :  { %v236_v50 = vsub.f32 %v232_v44, %v235_v49 }
 0x293   :  { %v237_v51 = vmul.f32 1.442695, %v236_v50 }
 0x295   :  { %410 = vpow2.f32 %v237_v51 }
 0x298   :  { %v311_v52 = vpop.xlane.xlu1 %310 }
 0x299   :  { %412 = vrcp.f32 %v311_v52 }
 0x29b   :  { %v411_v53 = vpop.eup %410 }
 0x29c   :  { %v239_v54 = vsel %vm92_vm1, %v411_v53, 0.0 }
 0x29d   :  { %240 = vadd.xlane.f32.xlu0 %v239_v54 }
 0x29f   :  { %v413_v56 = vpop.eup %412 }
 0x2a0   :  { %v313_v57 = vmul.f32 %v413_v56, %v409_v47 }
 0x2a2   :  { %v317_v58 = vmul.f32 1.1111112, %v313_v57 }
 0x2a4   :  { %v318_v59 = vsel %vm316_vm5, %v317_v58, 0.0 }
 0x2a5   :  { %389 = vmatmul.msk.f32.vlgmr.msrb.gmra.mxu2 %vm108_vm3, %v318_v59 }
 0x310   :  { %v241_v60 = vpop.xlane.xlu0 %240 }
 0x311   :  { %414 = vrcp.f32 %v241_v60 }
 0x317   :  { %v415_v62 = vpop.eup %414 }
 0x318   :  { %v243_v63 = vmul.f32 %v415_v62, %v411_v53 }
 0x31a   :  { %v247_v0 = vmul.f32 1.1111112, %v243_v63 }
 0x31c   :  { %v248_v1 = vsel %vm246_vm6, %v247_v0, 0.0 }
 0x31d   :  { %386 = vmatmul.msk.f32.vlgmr.msrb.gmra.mxu3 %vm108_vm3, %v248_v1 }
 0x328   :  { %v339_v2 = vpop.f32.mrf.mxu2 }
 0x329   :  { %351 = vrot.lane.b32.xlu1 %v339_v2, %s526_s2 }
 0x39b   :  { %v352_v7 = vpop.permute.xlu1 %351 }
 0x3a0   :  { %v269_v3 = vpop.f32.mrf.mxu3 }
 0x3a1   :  { %347 = vrot.lane.b32.xlu0 %v269_v3, %s522_s24 }
 0x413   :  { %v348_v6 = vpop.permute.xlu0 %347 }
 0x414   :  { %v356_v8 = vsel %vm355_vm7, %v354_v5, %v348_v6 }
 0x415   :  { %v358_v9 = vsel %vm357_vm8, %v356_v8, %v352_v7 }
 0x416   :  { %359 = vst [vmem:[#allocation8] sm:$0xf] %v358_v9 }
 0x417   :  { %370 = dma.vmem_to_hbm [thread:$0]  %s366_s4, 64, %s368_s7, [#allocation4]  }
 0x418   :  { %516 = dma.done.wait [#allocation4], 64  }
 0x419   :  { %517 = vsyncadd [#allocation4], 4294967232 }
 0x41a   :  { %375 = vsyncpa [#allocation3], 1 }
 0x41b   :  { %376 = vsyncpa [#allocation6], 1 }
 0x41c   :  { %377 = vsyncpa [#allocation4], 1 }

</bundles_post_ra>
